<compile_context>
chip_gen: v6e
topology: v6e:2x2x1
jax: 0.10.0
libtpu: 0.0.40
codegen_flags: <defaults>
</compile_context>

<pallas_src>
import jax
import jax.numpy as jnp
from jax.experimental import pallas as pl
from jax.experimental.pallas import tpu as pltpu

EPS = 1e-5
DEFAULT_TILE_BYTES = 8 << 20          # ~8 MiB x-tile (review: good for v7x)
VMEM_LIMIT_BYTES = 48 << 20           # 4 x tile (in+out, double buffered) + slack


def _fbn_kernel(p_ref, x_ref, o_ref):
    # p_ref: (rb, 2) f32  [:, 0] = scale, [:, 1] = shift  (per row = per (n, c))
    # x_ref / o_ref: (rb, cb)
    p = p_ref[...]
    scale = p[:, 0:1]
    shift = p[:, 1:2]
    x = x_ref[...].astype(jnp.float32)
    o_ref[...] = (x * scale + shift).astype(o_ref.dtype)


def _choose_blocks(R, S, itemsize, target_bytes):
    """Pick (rb, cb). Blocks are (multiple of 8, multiple of 128) or full extent."""
    row_bytes = max(1, S * itemsize)
    max_rows = max(1, target_bytes // row_bytes)

    if R <= max_rows:
        # Whole array fits one tile.
        rb, cb = R, S
    elif max_rows >= 8:
        # Full-row column blocks: one contiguous HBM burst per pipeline step.
        rb, cb = (max_rows // 8) * 8, S
    else:
        # Rows too wide for the budget -> tile the lane dimension too.
        rb = R if R <= 8 else 8
        cb_max = max(1, target_bytes // (rb * itemsize))
        cb = min(S, max(128, (cb_max // 128) * 128))
        if cb < S:
            cb = (cb // 128) * 128  # keep sub-extent blocks 128-aligned

    # Megacore (v7x, 2 TCs): guarantee >=2 grid steps along a parallel axis.
    if pl.cdiv(R, rb) * pl.cdiv(S, cb) == 1:
        if R >= 16:
            rb = max(8, ((R // 2) // 8) * 8)
        elif S >= 256:
            cb = max(128, ((S // 2) // 128) * 128)
        # else: tiny input; a single block is fine.
    return rb, cb


def frozen_batch_norm_3d(x, weight, bias, running_mean, running_var,
                         *, target_tile_bytes=DEFAULT_TILE_BYTES):
    """x: (N, C, D, H, W); params: (C,). Returns same shape/dtype as x."""
    N, C, D, H, W = x.shape
    R = N * C
    S = D * H * W

    # Per-channel affine, hoisted out of the kernel (f32 for accuracy).
    f32 = jnp.float32
    scale = weight.astype(f32) * jax.lax.rsqrt(running_var.astype(f32) + EPS)
    shift = bias.astype(f32) - running_mean.astype(f32) * scale
    params = jnp.stack([scale, shift], axis=-1)                     # (C, 2)
    row_params = jnp.broadcast_to(params[None], (N, C, 2)).reshape(R, 2)

    # Pure reshape (row-major NCDHW -> (N*C, D*H*W)): no data movement.
    x2d = x.reshape(R, S)

    itemsize = jnp.dtype(x.dtype).itemsize
    rb, cb = _choose_blocks(R, S, itemsize, target_tile_bytes)

    # Column axis last -> fastest varying; param blocks (index (i, 0)) are not
    # re-fetched across column steps.
    grid = (pl.cdiv(R, rb), pl.cdiv(S, cb))

    x_spec = pl.BlockSpec((rb, cb), lambda i, j: (i, j))
    p_spec = pl.BlockSpec((rb, 2), lambda i, j: (i, 0))

    out2d = pl.pallas_call(
        _fbn_kernel,
        out_shape=jax.ShapeDtypeStruct((R, S), x.dtype),
        grid_spec=pltpu.PrefetchScalarGridSpec(
            num_scalar_prefetch=0,
            grid=grid,
            in_specs=[p_spec, x_spec],
            out_specs=x_spec,
        ),
        compiler_params=pltpu.CompilerParams(
            dimension_semantics=("parallel", "parallel"),
            vmem_limit_bytes=VMEM_LIMIT_BYTES,
        ),
    )(row_params, x2d)

    return out2d.reshape(N, C, D, H, W)


def _reference(x, weight, bias, running_mean, running_var):
    w = weight.reshape(1, -1, 1, 1, 1)
    b = bias.reshape(1, -1, 1, 1, 1)
    rv = running_var.reshape(1, -1, 1, 1, 1)
    rm = running_mean.reshape(1, -1, 1, 1, 1)
    scale = w * jax.lax.rsqrt(rv + EPS)
    shift = b - rm * scale
    return x * scale + shift


def _make_inputs(key, shape):
    N, C, D, H, W = shape
    kx, kw, kb, km, kv = jax.random.split(key, 5)
    x = jax.random.normal(kx, shape, dtype=jnp.float32)
    weight = 1.0 + 0.1 * jax.random.normal(kw, (C,), jnp.float32)
    bias = 0.1 * jax.random.normal(kb, (C,), jnp.float32)
    running_mean = 0.1 * jax.random.normal(km, (C,), jnp.float32)
    running_var = 1.0 + 0.1 * jnp.abs(jax.random.normal(kv, (C,), jnp.float32))
    return x, weight, bias, running_mean, running_var


if __name__ == "__main__":
    key = jax.random.PRNGKey(0)
    k1, k2, k3 = jax.random.split(key, 3)

    # Case 1: 128-aligned lane extent; grid split to (1, 2) for megacore.
    args1 = _make_inputs(k1, (2, 4, 4, 8, 16))          # R=8,  S=512
    out1 = jax.block_until_ready(frozen_batch_norm_3d(*args1))
    assert out1.shape == args1[0].shape
    assert jnp.allclose(out1, _reference(*args1), atol=1e-5, rtol=1e-5)

    # Case 2: lane extent NOT a multiple of 128 (full-extent masked blocks).
    args2 = _make_inputs(k2, (2, 3, 3, 5, 7))           # R=6,  S=105
    out2 = jax.block_until_ready(frozen_batch_norm_3d(*args2))
    assert jnp.allclose(out2, _reference(*args2), atol=1e-5, rtol=1e-5)

    # Case 3: tiny tile budget to exercise multi-block grid with ragged row
    # and column tails + per-row param broadcast across row blocks.
    args3 = _make_inputs(k3, (3, 5, 2, 4, 40))          # R=15, S=320
    out3 = jax.block_until_ready(
        frozen_batch_norm_3d(*args3, target_tile_bytes=4096))
    assert jnp.allclose(out3, _reference(*args3), atol=1e-5, rtol=1e-5)

    print("KERNEL_OK")
</pallas_src>

<mosaic_0001>
module attributes {stable_mosaic.version = 11 : i64} {
  func.func @_fbn_kernel(%arg0: i32, %arg1: i32, %arg2: memref<8x2xf32, #tpu.memory_space<vmem>>, %arg3: memref<8x256xf32, #tpu.memory_space<vmem>>, %arg4: memref<8x256xf32, #tpu.memory_space<vmem>>) attributes {dimension_semantics = [#tpu.dimension_semantics<parallel>, #tpu.dimension_semantics<parallel>], iteration_bounds = array<i64: 1, 2>, scalar_prefetch = 0 : i64, scratch_operands = 0 : i64, tpu.core_type = #tpu.core_type<tc>, window_params = [{transform_indices = @transform_0, window_bounds = array<i64: 8, 2>}, {transform_indices = @transform_1, window_bounds = array<i64: 8, 256>}, {transform_indices = @transform_2, window_bounds = array<i64: 8, 256>}]} {
    %c0 = arith.constant 0 : index
    %c0_0 = arith.constant 0 : index
    %0 = vector.load %arg2[%c0, %c0_0] : memref<8x2xf32, #tpu.memory_space<vmem>>, vector<8x2xf32>
    %1 = vector.extract_strided_slice %0 {offsets = [0, 0], sizes = [8, 1], strides = [1, 1]} : vector<8x2xf32> to vector<8x1xf32>
    %2 = vector.extract_strided_slice %0 {offsets = [0, 1], sizes = [8, 1], strides = [1, 1]} : vector<8x2xf32> to vector<8x1xf32>
    %c0_1 = arith.constant 0 : index
    %c0_2 = arith.constant 0 : index
    %3 = vector.load %arg3[%c0_1, %c0_2] : memref<8x256xf32, #tpu.memory_space<vmem>>, vector<8x256xf32>
    %4 = vector.broadcast %1 : vector<8x1xf32> to vector<8x256xf32>
    %5 = arith.mulf %3, %4 : vector<8x256xf32>
    %6 = vector.broadcast %2 : vector<8x1xf32> to vector<8x256xf32>
    %7 = arith.addf %5, %6 : vector<8x256xf32>
    %c0_3 = arith.constant 0 : index
    %c0_4 = arith.constant 0 : index
    %8 = vector.load %arg4[%c0_3, %c0_4] : memref<8x256xf32, #tpu.memory_space<vmem>>, vector<8x256xf32>
    tpu.vector_store %arg4[%c0_3, %c0_4], %7 {strides = array<i32>} : memref<8x256xf32, #tpu.memory_space<vmem>>, vector<8x256xf32>,
    return
  }
  func.func @transform_0(%arg0: i32, %arg1: i32) -> (i32, i32) {
    %c0_i32 = arith.constant 0 : i32
    %c0_i32_0 = arith.constant 0 : i32
    return %arg0, %c0_i32 : i32, i32
  }
  func.func @transform_1(%arg0: i32, %arg1: i32) -> (i32, i32) {
    %c0_i32 = arith.constant 0 : i32
    return %arg0, %arg1 : i32, i32
  }
  func.func @transform_2(%arg0: i32, %arg1: i32) -> (i32, i32) {
    %c0_i32 = arith.constant 0 : i32
    return %arg0, %arg1 : i32, i32
  }
}

</mosaic_0001>

<bundles_post_ra>
// kernel: tpu_custom_call.1
= control target key start
LH: loop header
LB: loop body
LE: loop exit
PB: predicated region body
PF: predicated region fallthrough
CT: control target
= control target key end

     0   :  { %7 = vsyncpa [#allocation3], 0  ;;  %s687_s0 = inlined_call_operand.vmem [shape: f32[8,2], index: 0, kind: input, shape index: {}]   ;;  %s688_s1 = inlined_call_operand.hbm [shape: f32[8,512], index: 1, kind: input, shape index: {}]   ;;  %s689_s2 = inlined_call_operand.hbm [shape: f32[8,512], index: 2, kind: output, shape index: {}]  }
   0x1   :  { %9 = vsyncpa [#allocation3 + $0x1], 0 }
   0x2   :  { %10 = vsyncpa [#allocation4], 0 }
   0x3   :  { %12 = vsyncpa [#allocation4 + $0x1], 0  ;;  %s544_s9 = smov 0   ;;  %s546_s10 = smov 0  }
   0x4   :  { %s548_s11 = smov 0   ;;  %s550_s12 = smov 0  }
   0x5   :  { %s552_s13 = smov 0   ;;  %s554_s14 = smov 0  }
   0x6 LB: > { %s331_s15 = sadd.s32 4294967295, %s523_s14   ;;  %s332_s16 = sadd.s32 4294967294, %s523_s14   ;;  %s523_s14 = sphi %s554_s14, %s18_s14   ;;  %s519_s13 = sphi %s552_s13, %s701_s13   ;;  %s515_s12 = sphi %s550_s12, %s700_s12   ;;  %s511_s11 = sphi %s548_s11, %s699_s11   ;;  %s507_s10 = sphi %s546_s10, %s698_s10   ;;  %s503_s9 = sphi %s544_s9, %s697_s9  }
   0x7   : > { %s27_s17 = sadd.s32 1, %s519_s13  ;;  %s65_s18 = sadd.s32 1, %s511_s11 }
   0x8   : > { %p28_p0 = scmp.ge.s32.totalorder %s27_s17, 2  ;;  %p72_p1 = scmp.ne.s32.totalorder %s511_s11, %s507_s10 }
   0x9   : > { %p73_p2 = scmp.eq.s32.totalorder %s523_s14, 0  ;;  %p78_p3 = scmp.ne.s32.totalorder %s507_s10, %s503_s9 }
   0xa   : > { %s703_s17 = smov (%p28_p0, %s27_s17), 0  ;;  %p79_p5 = scmp.eq.s32.totalorder %s331_s15, 0 }
   0xb   : > { %p585_p4 = por %p73_p2, %p72_p1  ;;  %s61_s20 = ssub.s32 %s519_s13, %s703_s17 }
   0xc   : > { %p104_p6 = scmp.eq.s32.totalorder %s331_s15, 1  ;;  %p63_p7 = scmp.eq.s32.totalorder %s61_s20, 0 }
   0xd   : > { %p591_p8 = por %p79_p5, %p78_p3  ;;  %p110_p10 = scmp.eq.s32.totalorder %s332_s16, 1 }
   0xe   : > { %p595_p9 = por %p104_p6, %p72_p1  ;;  %p361_p13 = scmp.lt.s32.totalorder %s523_s14, 2 }
   0xf   : > { %s600_s23 = scalar_select %p63_p7, %s511_s11, %s65_s18  }
  0x10   : > { %p602_p11 = por %p110_p10, %p78_p3  ;;  %s137_s25 = sand.u32 1, %s511_s11  }
  0x11   : > { %s336_s26 = sshll.u32 %s137_s25, 4  ;;  %s347_s27 = sshll.u32 %s519_s13, 8 }
  0x12   : > { %s693_s24 = scalar_select %p602_p11, 1, 0 }
  0x13   : > { %s149_s30 = scalar_lea.hbm %s688_s1, %s347_s27  ;;  %s141_s3 = scalar_lea.vmem [#allocation2], %s336_s26 }
  0x14   : > { %s151_s4 = sshll.u32 %s141_s3, 4  ;;  %p615_p0 = pnand %p361_p13, %p585_p4  ;;  %s152_s4 = int_to_ptr.vmem [resolvable:$true] %s151_s4 }
  0x15   : > { %p339_p1 = scmp.ge.s32.totalorder %s523_s14, 1  ;;  %p156_p2 = scmp.lt.s32.totalorder %s523_s14, 3 }
  0x16   : > { %s138_s6 = scalar_lea.sflag [#allocation3], %s137_s25  ;;  %p417_p3 = pneg %p615_p0 }
  0x17   : > { %s428_s7 = scalar_lea.vmem %s152_s4, 256  ;;  %s525_s8 = smov [#allocation2]  }
  0x18   : > { %p429_p5 = scmp.ne.s32.totalorder %s152_s4, %s428_s7  ;;  %s433_s15 = sshll.u32 %s525_s8, 4  ;;  %s434_s15 = int_to_ptr.vmem [resolvable:$false] %s433_s15 }
  0x19   : > { %s435_s16 = scalar_lea.vmem %s434_s15, 512  ;;  %p436_p10 = scmp.lt.s32.totalorder %s152_s4, %s434_s15 }
  0x1a   : > { %p431_p6 = pnand %p429_p5, %p417_p3  ;;  %p437_p12 = scmp.lt.s32.totalorder %s435_s16, %s428_s7 }
  0x1c   : > { %p432_p7 = pneg %p431_p6  ;;  %p438_p4 = por %p437_p12, %p436_p10 }
  0x1e   : > { %p439_p13 = pnand %p438_p4, %p432_p7 }
  0x20   : > { %442 = shalt.err (!%p439_p13)
}
  0x21   : > { %356 = dma.hbm_to_vmem [thread:$0]  (!%p615_p0), %s149_s30, 256, %s152_s4, %s138_s6  }
  0x22   : > { %p157_p11 = pnand %p339_p1, %p156_p2 }
  0x23   : > { %s630_s18 = sand.u32 (!%p157_p11), 1, %s507_s10  }
  0x24   : > { %160 = sbr.rel (%p157_p11) target bundleno = 188 (0xbc), region = 28  ;;  %s340_s19 = sshll.u32 (!%p157_p11), %s630_s18, 4 }
  0x25   : > { %s163_s20 = scalar_lea.sflag (!%p157_p11), [#allocation3], %s630_s18  ;;  %s166_s25 = scalar_lea.vmem (!%p157_p11), [#allocation2], %s340_s19 }
  0x29   : > { %494 = dma.done.wait (%p591_p8), %s163_s20, 256  }
  0x2a   : > { %496 = vsyncadd (%p591_p8), %s163_s20, 4294967040  ;;  %v526_v0 = vmov 0   ;;  %v197_v1 = vld [vmem:[%s687_s0] sm:$0xff]  ;;  %v527_v2 = vmov 1   ;;  %v199_v5 = vld [vmem:[%s166_s25 + $0x8] sm:$0xff]  ;;  %s348_s28 = sshll.u32 %s515_s12, 8 }
  0x2b   : > { %413 = vset.pattern.permute.xlu0 %v526_v0  ;;  %v198_v4 = vld [vmem:[%s166_s25] sm:$0xff]  ;;  %s190_s29 = scalar_lea.vmem [#allocation5], %s340_s19  ;;  %s645_s4 = scalar_lea.hbm %s689_s2, %s348_s28 }
  0x2c   : > { %202 = vperm.xlu0 %413, %v197_v1   ;;  %s232_s21 = sshll.u32 %s190_s29, 4  ;;  %s216_s5 = scalar_lea.sflag [#allocation4], %s630_s18  ;;  %s233_s21 = int_to_ptr.vmem [resolvable:$true] %s232_s21 }
  0x2d   : > { %s443_s6 = scalar_lea.vmem %s233_s21, 256  ;;  %s528_s12 = smov [#allocation5]  }
  0x2e   : > { %p444_p8 = scmp.ne.s32.totalorder %s233_s21, %s443_s6  ;;  %s447_s7 = sshll.u32 %s528_s12, 4  ;;  %s448_s7 = int_to_ptr.vmem [resolvable:$false] %s447_s7 }
  0x2f   : > { %s449_s8 = scalar_lea.vmem %s448_s7, 512  ;;  %p450_p0 = scmp.lt.s32.totalorder %s233_s21, %s448_s7 }
  0x30   : > { %414 = vset.pattern.permute.xlu0 %v527_v2  ;;  %p445_p11 = pnand %p444_p8, %p595_p9  ;;  %p451_p1 = scmp.lt.s32.totalorder %s449_s8, %s443_s6 }
  0x31   : > { %208 = vperm.xlu0 %414, %v197_v1  }
  0x32   : > { %p446_p12 = pneg %p445_p11  ;;  %p452_p2 = por %p451_p1, %p450_p0 }
  0x34   : > { %p453_p3 = pnand %p452_p2, %p446_p12 }
  0xa7   : > { %v203_v3 = vpop.permute.xlu0 %202 }
  0xa8   : > { %v205_v6 = vmul.f32 %v203_v3, %v198_v4  ;;  %v206_v7 = vmul.f32 %v203_v3, %v199_v5 }
  0xac   : > { %v209_v8 = vpop.permute.xlu0 %208 }
  0xad   : > { %v211_v9 = vadd.f32 %v209_v8, %v205_v6  ;;  %v212_v10 = vadd.f32 %v209_v8, %v206_v7 }
  0xaf   : > { %213 = vst [vmem:[%s190_s29] sm:$0xff] %v211_v9  ;;  %214 = vst [vmem:[%s190_s29 + $0x8] sm:$0xff] %v212_v10 }
  0xb0   : > { %456 = shalt.err (!%p453_p3)
}
  0xb1   : > { %s457_s15 = scalar_lea.hbm %s645_s4, 256  ;;  %s461_s19 = scalar_lea.hbm %s689_s2, 512 }
  0xb2   : > { %p458_p5 = scmp.ne.s32.totalorder %s645_s4, %s457_s15  ;;  %p462_p10 = scmp.lt.s32.totalorder %s645_s4, %s689_s2 }
  0xb3   : > { %p463_p4 = scmp.lt.s32.totalorder %s461_s19, %s457_s15 }
  0xb4   : > { %p459_p6 = pnand %p458_p5, %p595_p9 }
  0xb5   : > { %p464_p13 = por %p463_p4, %p462_p10 }
  0xb6   : > { %p460_p7 = pneg %p459_p6 }
  0xb8   : > { %p465_p8 = pnand %p464_p13, %p460_p7 }
  0xba   : > { %468 = shalt.err (!%p465_p8)
}
  0xbb   : > { %351 = dma.vmem_to_hbm [thread:$0]  (%p595_p9), %s233_s21, 256, %s645_s4, %s216_s5  }
  0xbc PF: > { %s244_s26 = sand.u32 1, %s503_s9   ;;  %p695_p11 = scmp.ne.s32.totalorder %s693_s24, 0 }
  0xbd   : > { %p696_p12 = scmp.ge.s32.totalorder %s523_s14, 2  ;;  %s245_s27 = scalar_lea.sflag [#allocation4], %s244_s26 }
  0xbf   : > { %p358_p0 = pnand %p696_p12, %p695_p11 }
  0xc1   : > { %p359_p1 = pneg %p358_p0 }
  0xc3   : > { %498 = dma.done.wait (%p359_p1), %s245_s27, 256  }
  0xc4   : > { %500 = vsyncadd (%p359_p1), %s245_s27, 4294967040  ;;  %s18_s14 = sadd.s32 1, %s523_s14   ;;  %s697_s9 = smov %s507_s10 }
  0xc5   : > { %p15_p2 = scmp.ge.s32.totalorder %s18_s14, 4   ;;  %s698_s10 = smov %s511_s11 }
  0xc6   : > { %s699_s11 = smov %s600_s23  ;;  %s700_s12 = smov %s519_s13 }
  0xc7   : > { %s701_s13 = smov %s703_s17  ;;  %17 = sbr.rel (!%p15_p2) target bundleno = 6 (0x6), region = 76 }
  0xcc   :  { %250 = vsyncpa [#allocation3], 1 }
  0xcd   :  { %252 = vsyncpa [#allocation3 + $0x1], 1 }
  0xce   :  { %253 = vsyncpa [#allocation4], 1 }
  0xcf   :  { %255 = vsyncpa [#allocation4 + $0x1], 1 }

</bundles_post_ra>
